<compile_context>
chip_gen: v7x
topology: tpu7x:2x2x1
jax: 0.10.0
libtpu: 0.0.40
codegen_flags: <defaults>
</compile_context>

<pallas_src>
import math
import functools

import jax
import jax.numpy as jnp
import numpy as np
from jax.experimental import pallas as pl
from jax.experimental.pallas import tpu as pltpu


def _mhc_kernel(x_ref, wqkv_ref, bqkv_ref, wconv_ref, bconv_ref, wout_ref,
                bout_ref, o_ref, *, num_heads, compute_dtype):
    _, S, D = x_ref.shape
    H = num_heads
    Dh = D // H
    cd = compute_dtype
    f32 = jnp.float32
    approx_recip = jnp.dtype(cd) != jnp.dtype(jnp.float32)

    x = x_ref[0]                                       # (S, D) f32

    # Weights arrive already scaled + cast to the compute dtype (done once in
    # the wrapper); biases stay f32 and are added to the f32 accumulators.
    wqkv = wqkv_ref[...]                               # (D, 3D)  Q cols pre-scaled
    wconv = wconv_ref[...]                             # (3D, D)  tap-major rows, pre-scaled
    wout = wout_ref[...]                               # (D, D)
    bqkv = bqkv_ref[0]                                 # (3D,) f32, Q slice pre-scaled
    bconv = bconv_ref[0]                               # (D,)  f32, pre-scaled
    bout = bout_ref[0]                                 # (D,)  f32

    # --- fused QKV projection (one MXU pass, f32 accumulate) ---
    qkv = jnp.dot(x.astype(cd), wqkv, preferred_element_type=f32) + bqkv   # (S, 3D)

    def split_heads(t):      # (S, D) -> (H, S, Dh): head-major batch axis
        return jnp.stack([t[:, h * Dh:(h + 1) * Dh] for h in range(H)], axis=0)

    def merge_heads(t):      # (H, S, Dh) -> (S, (h d)) channel order
        return jnp.concatenate([t[h] for h in range(H)], axis=-1)

    qh = split_heads(qkv[:, 0 * D:1 * D]).astype(cd)   # pre-scaled queries
    kh = split_heads(qkv[:, 1 * D:2 * D]).astype(cd)   # reused by both passes
    vh = split_heads(qkv[:, 2 * D:3 * D]).astype(cd)

    # --- shared attention machinery (causal mask hoisted, reused twice) ---
    row = jax.lax.broadcasted_iota(jnp.int32, (S, S), 0)
    col = jax.lax.broadcasted_iota(jnp.int32, (S, S), 1)
    causal = (row >= col)[None]                        # (1, S, S), broadcast over H

    def attention(q_hsd):    # (H, S, Dh) pre-scaled compute-dtype queries -> (S, D) f32
        s = jnp.einsum('hqd,hkd->hqk', q_hsd, kh,
                       preferred_element_type=f32)     # (H, S, S), one batched dot
        s = jnp.where(causal, s, -jnp.inf)             # diag always kept -> no 0/0
        m = jnp.max(s, axis=-1, keepdims=True)
        p = jnp.exp(s - m)                             # f32 softmax numerator (EUP)
        denom = jnp.sum(p, axis=-1, keepdims=True)     # (H, S, 1)
        o = jnp.einsum('hqk,hkd->hqd', p.astype(cd), vh,
                       preferred_element_type=f32)     # (H, S, Dh)
        # deferred softmax normalization (EUP reciprocal, O(S*Dh) multiply)
        o = o * pl.reciprocal(denom, approx=approx_recip)
        return merge_heads(o)

    ctx = attention(qh)                                # (S, D)

    # --- conv1d(k=3, pad=1): XLU roll shifts + boundary zeroing, one K=3D matmul ---
    sidx = jax.lax.broadcasted_iota(jnp.int32, (S, 1), 0)
    prev = jnp.where(sidx == 0, 0.0, pltpu.roll(ctx, shift=1, axis=0))          # ctx[t-1]
    nxt = jnp.where(sidx == S - 1, 0.0, pltpu.roll(ctx, shift=S - 1, axis=0))   # ctx[t+1]
    cat = jnp.concatenate([prev, ctx, nxt], axis=-1)                            # (S, 3D)
    conv = jnp.dot(cat.astype(cd), wconv, preferred_element_type=f32) + bconv   # (S, D), pre-scaled

    # --- second attention: conv output re-queries the same K / V ---
    ctx2 = attention(split_heads(conv).astype(cd))     # (S, D)

    # --- output projection ---
    out = jnp.dot(ctx2.astype(cd), wout, preferred_element_type=f32) + bout
    o_ref[0] = out.astype(o_ref.dtype)


def mhc_forward(x, params, *, num_heads, compute_dtype=jnp.bfloat16):
    """x: (B, S, D) float32. params: kernel-layout weights (see init_params).

    compute_dtype: dtype of MXU inputs (accumulation is always f32, softmax math
    always f32). bfloat16 = production/throughput path; float32 = exact path.
    """
    B, S, D = x.shape
    cd = compute_dtype
    scale = 1.0 / math.sqrt(D // num_heads)

    # Fold the softmax scale into the query-producing weights: pass 1 queries
    # come from Wqkv's first D columns (+ bqkv's first D entries), pass 2
    # queries come from the conv. The fold is a one-time weight transform fused
    # with the dtype cast, so the kernel consumes pre-scaled queries and does
    # zero in-kernel scale multiplies. Biases stay f32 (added to f32 accums).
    col_scale = jnp.concatenate(
        [jnp.full((D,), scale, jnp.float32), jnp.ones((2 * D,), jnp.float32)])
    wqkv = (params["wqkv"] * col_scale[None, :]).astype(cd)
    bqkv = params["bqkv"] * col_scale[None, :]
    wconv = (params["wconv"].reshape(3 * D, D) * scale).astype(cd)   # taps flattened to K=3D
    bconv = params["bconv"] * scale
    wout = params["wout"].astype(cd)

    kernel = functools.partial(_mhc_kernel, num_heads=num_heads, compute_dtype=cd)
    return pl.pallas_call(
        kernel,
        out_shape=jax.ShapeDtypeStruct((B, S, D), x.dtype),
        grid=(B,),
        in_specs=[
            pl.BlockSpec((1, S, D), lambda b: (b, 0, 0)),      # x
            # NOTE: the specs below are grid-invariant (constant index_map), so
            # their tiles are fetched once; on jax versions supporting it,
            # pipeline_mode=pl.Buffered(1) would additionally single-buffer them
            # and halve their VMEM footprint at real model sizes.
            pl.BlockSpec((D, 3 * D), lambda b: (0, 0)),        # Wqkv (Q cols pre-scaled)
            pl.BlockSpec((1, 3 * D), lambda b: (0, 0)),        # bqkv (f32)
            pl.BlockSpec((3 * D, D), lambda b: (0, 0)),        # conv taps (3D, D), pre-scaled
            pl.BlockSpec((1, D), lambda b: (0, 0)),            # bconv (f32)
            pl.BlockSpec((D, D), lambda b: (0, 0)),            # Wout
            pl.BlockSpec((1, D), lambda b: (0, 0)),            # bout (f32)
        ],
        out_specs=pl.BlockSpec((1, S, D), lambda b: (b, 0, 0)),
        compiler_params=pltpu.CompilerParams(
            dimension_semantics=("parallel",),                 # shards over 2 TCs on v7x
            vmem_limit_bytes=48 * 1024 * 1024,                 # explicit budget (< v7x 64 MiB)
        ),
    )(x, wqkv, bqkv, wconv, bconv, wout, params["bout"])


def mhc_reference(x, params, *, num_heads):
    """Pure-JAX reference mirroring the PyTorch module (dropout=0, eval)."""
    B, S, D = x.shape
    H = num_heads
    Dh = D // H

    qkv = x @ params["wqkv"] + params["bqkv"][0]
    q, k, v = qkv[..., :D], qkv[..., D:2 * D], qkv[..., 2 * D:]
    qh = q.reshape(B, S, H, Dh)
    kh = k.reshape(B, S, H, Dh)
    vh = v.reshape(B, S, H, Dh)

    def attn(qh, kh, vh):
        scale = 1.0 / math.sqrt(Dh)
        s = jnp.einsum("bthd,bshd->bhts", qh, kh) * scale
        mask = jnp.tril(jnp.ones((S, S), dtype=bool))
        s = jnp.where(mask, s, -jnp.inf)
        a = jax.nn.softmax(s, axis=-1)
        return jnp.einsum("bhts,bshd->bthd", a, vh)

    ctx = attn(qh, kh, vh).reshape(B, S, D)
    prev = jnp.pad(ctx, ((0, 0), (1, 0), (0, 0)))[:, :S]
    nxt = jnp.pad(ctx, ((0, 0), (0, 1), (0, 0)))[:, 1:]
    conv = (prev @ params["wconv"][0] + ctx @ params["wconv"][1]
            + nxt @ params["wconv"][2] + params["bconv"][0])
    ctx2 = attn(conv.reshape(B, S, H, Dh), kh, vh).reshape(B, S, D)
    return ctx2 @ params["wout"] + params["bout"][0]


def init_params(key, d_model):
    """Deterministic synthetic parameters (shapes match nn.Module __init__)."""
    D = d_model
    ks = jax.random.split(key, 6)
    # nn.Linear(d_model, 3*d_model): weight (3D, D) -> stored transposed (D, 3D)
    wqkv = jax.random.normal(ks[0], (D, 3 * D), jnp.float32) * (1.0 / math.sqrt(D))
    bqkv = jax.random.normal(ks[1], (1, 3 * D), jnp.float32) * 0.02
    # nn.Conv1d(D, D, 3): weight (D_out, D_in, 3) -> stored as taps (3, D_in, D_out)
    wconv_t = jax.random.normal(ks[2], (D, D, 3), jnp.float32) * (1.0 / math.sqrt(3 * D))
    wconv = jnp.transpose(wconv_t, (2, 1, 0))            # (3, D_in, D_out)
    bconv = jax.random.normal(ks[3], (1, D), jnp.float32) * 0.02
    # nn.Linear(d_model, d_model): weight (D, D) -> transposed (D, D)
    wout = jax.random.normal(ks[4], (D, D), jnp.float32) * (1.0 / math.sqrt(D))
    bout = jax.random.normal(ks[5], (1, D), jnp.float32) * 0.02
    return {"wqkv": wqkv, "bqkv": bqkv, "wconv": wconv, "bconv": bconv,
            "wout": wout, "bout": bout}


if __name__ == "__main__":
    B, S, D, H = 2, 16, 32, 4   # batch, seq, d_model, num_heads (head_dim = 8)

    key = jax.random.PRNGKey(0)
    kx, kp = jax.random.split(key)
    x = jax.random.normal(kx, (B, S, D), jnp.float32)
    params = init_params(kp, D)

    ref = jax.block_until_ready(mhc_reference(x, params, num_heads=H))

    # Exact-precision path: f32 MXU inputs + exact reciprocal -> tight tolerance.
    out_f32 = jax.block_until_ready(
        mhc_forward(x, params, num_heads=H, compute_dtype=jnp.float32))
    np.testing.assert_allclose(np.asarray(out_f32), np.asarray(ref),
                               rtol=1e-4, atol=1e-4)

    # Throughput path: bf16 MXU inputs (f32 accumulate, f32 softmax), approx
    # reciprocal -> loose tolerance (bf16 rounding through 2 attention passes).
    out_bf16 = jax.block_until_ready(
        mhc_forward(x, params, num_heads=H, compute_dtype=jnp.bfloat16))
    np.testing.assert_allclose(np.asarray(out_bf16), np.asarray(ref),
                               rtol=2e-1, atol=2e-1)

    print("KERNEL_OK")
</pallas_src>

<mosaic_0001>
module attributes {stable_mosaic.version = 11 : i64} {
  func.func @_mhc_kernel(%arg0: i32, %arg1: memref<1x16x32xf32, #tpu.memory_space<vmem>>, %arg2: memref<32x96xf32, #tpu.memory_space<vmem>>, %arg3: memref<1x96xf32, #tpu.memory_space<vmem>>, %arg4: memref<96x32xf32, #tpu.memory_space<vmem>>, %arg5: memref<1x32xf32, #tpu.memory_space<vmem>>, %arg6: memref<32x32xf32, #tpu.memory_space<vmem>>, %arg7: memref<1x32xf32, #tpu.memory_space<vmem>>, %arg8: memref<1x16x32xf32, #tpu.memory_space<vmem>>) attributes {dimension_semantics = [#tpu.dimension_semantics<parallel>], iteration_bounds = array<i64: 2>, scalar_prefetch = 0 : i64, scratch_operands = 0 : i64, tpu.core_type = #tpu.core_type<tc>, window_params = [{transform_indices = @transform_0, window_bounds = array<i64: 1, 16, 32>}, {pipeline_mode = #tpu.pipeline_mode<synchronous>, transform_indices = @transform_1, window_bounds = array<i64: 32, 96>}, {pipeline_mode = #tpu.pipeline_mode<synchronous>, transform_indices = @transform_2, window_bounds = array<i64: 1, 96>}, {pipeline_mode = #tpu.pipeline_mode<synchronous>, transform_indices = @transform_3, window_bounds = array<i64: 96, 32>}, {pipeline_mode = #tpu.pipeline_mode<synchronous>, transform_indices = @transform_4, window_bounds = array<i64: 1, 32>}, {pipeline_mode = #tpu.pipeline_mode<synchronous>, transform_indices = @transform_5, window_bounds = array<i64: 32, 32>}, {pipeline_mode = #tpu.pipeline_mode<synchronous>, transform_indices = @transform_6, window_bounds = array<i64: 1, 32>}, {transform_indices = @transform_7, window_bounds = array<i64: 1, 16, 32>}]} {
    %c0 = arith.constant 0 : index
    %c0_0 = arith.constant 0 : index
    %c0_1 = arith.constant 0 : index
    %0 = vector.load %arg1[%c0, %c0_0, %c0_1] : memref<1x16x32xf32, #tpu.memory_space<vmem>>, vector<1x16x32xf32>
    %1 = vector.shape_cast %0 : vector<1x16x32xf32> to vector<16x32xf32>
    %c0_2 = arith.constant 0 : index
    %c0_3 = arith.constant 0 : index
    %2 = vector.load %arg2[%c0_2, %c0_3] : memref<32x96xf32, #tpu.memory_space<vmem>>, vector<32x96xf32>
    %c0_4 = arith.constant 0 : index
    %c0_5 = arith.constant 0 : index
    %3 = vector.load %arg4[%c0_4, %c0_5] : memref<96x32xf32, #tpu.memory_space<vmem>>, vector<96x32xf32>
    %c0_6 = arith.constant 0 : index
    %c0_7 = arith.constant 0 : index
    %4 = vector.load %arg6[%c0_6, %c0_7] : memref<32x32xf32, #tpu.memory_space<vmem>>, vector<32x32xf32>
    %c0_8 = arith.constant 0 : index
    %c0_9 = arith.constant 0 : index
    %5 = vector.load %arg3[%c0_8, %c0_9] : memref<1x96xf32, #tpu.memory_space<vmem>>, vector<1x96xf32>
    %6 = vector.shape_cast %5 : vector<1x96xf32> to vector<96xf32>
    %c0_10 = arith.constant 0 : index
    %c0_11 = arith.constant 0 : index
    %7 = vector.load %arg5[%c0_10, %c0_11] : memref<1x32xf32, #tpu.memory_space<vmem>>, vector<1x32xf32>
    %8 = vector.shape_cast %7 : vector<1x32xf32> to vector<32xf32>
    %c0_12 = arith.constant 0 : index
    %c0_13 = arith.constant 0 : index
    %9 = vector.load %arg7[%c0_12, %c0_13] : memref<1x32xf32, #tpu.memory_space<vmem>>, vector<1x32xf32>
    %10 = vector.shape_cast %9 : vector<1x32xf32> to vector<32xf32>
    %cst = arith.constant dense<0.000000e+00> : vector<16x96xf32>
    %11 = tpu.matmul %1, %2, %cst {dimension_numbers = #tpu.dot_dimension_numbers<[1], [0], [0], [1], [0, 0, 1, 1], [], []>} : vector<16x32xf32>, vector<32x96xf32>, vector<16x96xf32> -> vector<16x96xf32>
    %12 = vector.shape_cast %6 : vector<96xf32> to vector<1x96xf32>
    %13 = vector.broadcast %12 : vector<1x96xf32> to vector<16x96xf32>
    %14 = arith.addf %11, %13 : vector<16x96xf32>
    %15 = vector.extract_strided_slice %14 {offsets = [0, 0], sizes = [16, 32], strides = [1, 1]} : vector<16x96xf32> to vector<16x32xf32>
    %16 = vector.extract_strided_slice %15 {offsets = [0, 0], sizes = [16, 8], strides = [1, 1]} : vector<16x32xf32> to vector<16x8xf32>
    %17 = vector.extract_strided_slice %15 {offsets = [0, 8], sizes = [16, 8], strides = [1, 1]} : vector<16x32xf32> to vector<16x8xf32>
    %18 = vector.extract_strided_slice %15 {offsets = [0, 16], sizes = [16, 8], strides = [1, 1]} : vector<16x32xf32> to vector<16x8xf32>
    %19 = vector.extract_strided_slice %15 {offsets = [0, 24], sizes = [16, 8], strides = [1, 1]} : vector<16x32xf32> to vector<16x8xf32>
    %20 = vector.shape_cast %16 : vector<16x8xf32> to vector<1x16x8xf32>
    %21 = vector.shape_cast %17 : vector<16x8xf32> to vector<1x16x8xf32>
    %22 = vector.shape_cast %18 : vector<16x8xf32> to vector<1x16x8xf32>
    %23 = vector.shape_cast %19 : vector<16x8xf32> to vector<1x16x8xf32>
    %24 = tpu.concatenate %20, %21, %22, %23 in 0 : vector<1x16x8xf32>, vector<1x16x8xf32>, vector<1x16x8xf32>, vector<1x16x8xf32> -> vector<4x16x8xf32>
    %25 = vector.extract_strided_slice %14 {offsets = [0, 32], sizes = [16, 32], strides = [1, 1]} : vector<16x96xf32> to vector<16x32xf32>
    %26 = vector.extract_strided_slice %25 {offsets = [0, 0], sizes = [16, 8], strides = [1, 1]} : vector<16x32xf32> to vector<16x8xf32>
    %27 = vector.extract_strided_slice %25 {offsets = [0, 8], sizes = [16, 8], strides = [1, 1]} : vector<16x32xf32> to vector<16x8xf32>
    %28 = vector.extract_strided_slice %25 {offsets = [0, 16], sizes = [16, 8], strides = [1, 1]} : vector<16x32xf32> to vector<16x8xf32>
    %29 = vector.extract_strided_slice %25 {offsets = [0, 24], sizes = [16, 8], strides = [1, 1]} : vector<16x32xf32> to vector<16x8xf32>
    %30 = vector.shape_cast %26 : vector<16x8xf32> to vector<1x16x8xf32>
    %31 = vector.shape_cast %27 : vector<16x8xf32> to vector<1x16x8xf32>
    %32 = vector.shape_cast %28 : vector<16x8xf32> to vector<1x16x8xf32>
    %33 = vector.shape_cast %29 : vector<16x8xf32> to vector<1x16x8xf32>
    %34 = tpu.concatenate %30, %31, %32, %33 in 0 : vector<1x16x8xf32>, vector<1x16x8xf32>, vector<1x16x8xf32>, vector<1x16x8xf32> -> vector<4x16x8xf32>
    %35 = vector.extract_strided_slice %14 {offsets = [0, 64], sizes = [16, 32], strides = [1, 1]} : vector<16x96xf32> to vector<16x32xf32>
    %36 = vector.extract_strided_slice %35 {offsets = [0, 0], sizes = [16, 8], strides = [1, 1]} : vector<16x32xf32> to vector<16x8xf32>
    %37 = vector.extract_strided_slice %35 {offsets = [0, 8], sizes = [16, 8], strides = [1, 1]} : vector<16x32xf32> to vector<16x8xf32>
    %38 = vector.extract_strided_slice %35 {offsets = [0, 16], sizes = [16, 8], strides = [1, 1]} : vector<16x32xf32> to vector<16x8xf32>
    %39 = vector.extract_strided_slice %35 {offsets = [0, 24], sizes = [16, 8], strides = [1, 1]} : vector<16x32xf32> to vector<16x8xf32>
    %40 = vector.shape_cast %36 : vector<16x8xf32> to vector<1x16x8xf32>
    %41 = vector.shape_cast %37 : vector<16x8xf32> to vector<1x16x8xf32>
    %42 = vector.shape_cast %38 : vector<16x8xf32> to vector<1x16x8xf32>
    %43 = vector.shape_cast %39 : vector<16x8xf32> to vector<1x16x8xf32>
    %44 = tpu.concatenate %40, %41, %42, %43 in 0 : vector<1x16x8xf32>, vector<1x16x8xf32>, vector<1x16x8xf32>, vector<1x16x8xf32> -> vector<4x16x8xf32>
    %45 = tpu.iota {dimensions = array<i32: 0>} : vector<16x16xi32>
    %46 = tpu.iota {dimensions = array<i32: 1>} : vector<16x16xi32>
    %47 = arith.cmpi sge, %45, %46 : vector<16x16xi32>
    %48 = vector.shape_cast %47 : vector<16x16xi1> to vector<1x16x16xi1>
    "tpu.trace_start"() <{level = 10 : i32, message = "hqd,hkd->hqk"}> : () -> ()
    %cst_14 = arith.constant dense<0.000000e+00> : vector<4x16x16xf32>
    %49 = tpu.matmul %24, %34, %cst_14 {dimension_numbers = #tpu.dot_dimension_numbers<[2], [2], [1], [1], [0, 0, 0, 1, 1, 1], [0], [0]>} : vector<4x16x8xf32>, vector<4x16x8xf32>, vector<4x16x16xf32> -> vector<4x16x16xf32>
    %cst_15 = arith.constant 0xFF800000 : f32
    "tpu.trace_stop"() : () -> ()
    %50 = vector.shape_cast %48 : vector<1x16x16xi1> to vector<1x16x16xi1>
    %51 = vector.broadcast %50 : vector<1x16x16xi1> to vector<4x16x16xi1>
    %52 = vector.broadcast %cst_15 : f32 to vector<4x16x16xf32>
    %53 = arith.select %51, %49, %52 : vector<4x16x16xi1>, vector<4x16x16xf32>
    %cst_16 = arith.constant dense<0xFF800000> : vector<4x16xf32>
    %54 = vector.multi_reduction <maximumf>, %53, %cst_16 [2] : vector<4x16x16xf32> to vector<4x16xf32>
    %55 = vector.shape_cast %54 : vector<4x16xf32> to vector<4x16x1xf32>
    %56 = vector.broadcast %55 : vector<4x16x1xf32> to vector<4x16x16xf32>
    %57 = arith.subf %53, %56 : vector<4x16x16xf32>
    %58 = math.exp %57 : vector<4x16x16xf32>
    %cst_17 = arith.constant dense<0.000000e+00> : vector<4x16xf32>
    %59 = vector.multi_reduction <add>, %58, %cst_17 [2] : vector<4x16x16xf32> to vector<4x16xf32>
    %60 = vector.shape_cast %59 : vector<4x16xf32> to vector<4x16x1xf32>
    "tpu.trace_start"() <{level = 10 : i32, message = "hqk,hkd->hqd"}> : () -> ()
    %cst_18 = arith.constant dense<0.000000e+00> : vector<4x16x8xf32>
    %61 = tpu.matmul %58, %44, %cst_18 {dimension_numbers = #tpu.dot_dimension_numbers<[2], [1], [1], [2], [0, 0, 0, 1, 1, 2], [0], [0]>} : vector<4x16x16xf32>, vector<4x16x8xf32>, vector<4x16x8xf32> -> vector<4x16x8xf32>
    "tpu.trace_stop"() : () -> ()
    %62 = tpu.reciprocal %60 : vector<4x16x1xf32> -> vector<4x16x1xf32>
    %63 = vector.broadcast %62 : vector<4x16x1xf32> to vector<4x16x8xf32>
    %64 = arith.mulf %61, %63 : vector<4x16x8xf32>
    %65 = vector.extract_strided_slice %64 {offsets = [0, 0, 0], sizes = [1, 16, 8], strides = [1, 1, 1]} : vector<4x16x8xf32> to vector<1x16x8xf32>
    %66 = vector.shape_cast %65 : vector<1x16x8xf32> to vector<16x8xf32>
    %67 = vector.extract_strided_slice %64 {offsets = [1, 0, 0], sizes = [1, 16, 8], strides = [1, 1, 1]} : vector<4x16x8xf32> to vector<1x16x8xf32>
    %68 = vector.shape_cast %67 : vector<1x16x8xf32> to vector<16x8xf32>
    %69 = vector.extract_strided_slice %64 {offsets = [2, 0, 0], sizes = [1, 16, 8], strides = [1, 1, 1]} : vector<4x16x8xf32> to vector<1x16x8xf32>
    %70 = vector.shape_cast %69 : vector<1x16x8xf32> to vector<16x8xf32>
    %71 = vector.extract_strided_slice %64 {offsets = [3, 0, 0], sizes = [1, 16, 8], strides = [1, 1, 1]} : vector<4x16x8xf32> to vector<1x16x8xf32>
    %72 = vector.shape_cast %71 : vector<1x16x8xf32> to vector<16x8xf32>
    %73 = tpu.concatenate %66, %68, %70, %72 in 1 : vector<16x8xf32>, vector<16x8xf32>, vector<16x8xf32>, vector<16x8xf32> -> vector<16x32xf32>
    %74 = tpu.iota {dimensions = array<i32: 0>} : vector<16x1xi32>
    %c0_i32 = arith.constant 0 : i32
    %75 = vector.broadcast %c0_i32 : i32 to vector<16x1xi32>
    %76 = arith.cmpi eq, %74, %75 : vector<16x1xi32>
    %c1_i32 = arith.constant 1 : i32
    %77 = tpu.dynamic_rotate %73 by %c1_i32 dim 0 : vector<16x32xf32>, i32 -> vector<16x32xf32>
    %cst_19 = arith.constant 0.000000e+00 : f32
    %78 = vector.shape_cast %76 : vector<16x1xi1> to vector<16x1xi1>
    %79 = vector.broadcast %78 : vector<16x1xi1> to vector<16x32xi1>
    %80 = vector.broadcast %cst_19 : f32 to vector<16x32xf32>
    %81 = arith.select %79, %80, %77 : vector<16x32xi1>, vector<16x32xf32>
    %c15_i32 = arith.constant 15 : i32
    %82 = vector.broadcast %c15_i32 : i32 to vector<16x1xi32>
    %83 = arith.cmpi eq, %74, %82 : vector<16x1xi32>
    %c15_i32_20 = arith.constant 15 : i32
    %84 = tpu.dynamic_rotate %73 by %c15_i32_20 dim 0 : vector<16x32xf32>, i32 -> vector<16x32xf32>
    %cst_21 = arith.constant 0.000000e+00 : f32
    %85 = vector.shape_cast %83 : vector<16x1xi1> to vector<16x1xi1>
    %86 = vector.broadcast %85 : vector<16x1xi1> to vector<16x32xi1>
    %87 = vector.broadcast %cst_21 : f32 to vector<16x32xf32>
    %88 = arith.select %86, %87, %84 : vector<16x32xi1>, vector<16x32xf32>
    %89 = tpu.concatenate %81, %73, %88 in 1 : vector<16x32xf32>, vector<16x32xf32>, vector<16x32xf32> -> vector<16x96xf32>
    %cst_22 = arith.constant dense<0.000000e+00> : vector<16x32xf32>
    %90 = tpu.matmul %89, %3, %cst_22 {dimension_numbers = #tpu.dot_dimension_numbers<[1], [0], [0], [1], [0, 0, 1, 1], [], []>} : vector<16x96xf32>, vector<96x32xf32>, vector<16x32xf32> -> vector<16x32xf32>
    %91 = vector.shape_cast %8 : vector<32xf32> to vector<1x32xf32>
    %92 = vector.broadcast %91 : vector<1x32xf32> to vector<16x32xf32>
    %93 = arith.addf %90, %92 : vector<16x32xf32>
    %94 = vector.extract_strided_slice %93 {offsets = [0, 0], sizes = [16, 8], strides = [1, 1]} : vector<16x32xf32> to vector<16x8xf32>
    %95 = vector.extract_strided_slice %93 {offsets = [0, 8], sizes = [16, 8], strides = [1, 1]} : vector<16x32xf32> to vector<16x8xf32>
    %96 = vector.extract_strided_slice %93 {offsets = [0, 16], sizes = [16, 8], strides = [1, 1]} : vector<16x32xf32> to vector<16x8xf32>
    %97 = vector.extract_strided_slice %93 {offsets = [0, 24], sizes = [16, 8], strides = [1, 1]} : vector<16x32xf32> to vector<16x8xf32>
    %98 = vector.shape_cast %94 : vector<16x8xf32> to vector<1x16x8xf32>
    %99 = vector.shape_cast %95 : vector<16x8xf32> to vector<1x16x8xf32>
    %100 = vector.shape_cast %96 : vector<16x8xf32> to vector<1x16x8xf32>
    %101 = vector.shape_cast %97 : vector<16x8xf32> to vector<1x16x8xf32>
    %102 = tpu.concatenate %98, %99, %100, %101 in 0 : vector<1x16x8xf32>, vector<1x16x8xf32>, vector<1x16x8xf32>, vector<1x16x8xf32> -> vector<4x16x8xf32>
    "tpu.trace_start"() <{level = 10 : i32, message = "hqd,hkd->hqk"}> : () -> ()
    %cst_23 = arith.constant dense<0.000000e+00> : vector<4x16x16xf32>
    %103 = tpu.matmul %102, %34, %cst_23 {dimension_numbers = #tpu.dot_dimension_numbers<[2], [2], [1], [1], [0, 0, 0, 1, 1, 1], [0], [0]>} : vector<4x16x8xf32>, vector<4x16x8xf32>, vector<4x16x16xf32> -> vector<4x16x16xf32>
    %cst_24 = arith.constant 0xFF800000 : f32
    "tpu.trace_stop"() : () -> ()
    %104 = vector.shape_cast %48 : vector<1x16x16xi1> to vector<1x16x16xi1>
    %105 = vector.broadcast %104 : vector<1x16x16xi1> to vector<4x16x16xi1>
    %106 = vector.broadcast %cst_24 : f32 to vector<4x16x16xf32>
    %107 = arith.select %105, %103, %106 : vector<4x16x16xi1>, vector<4x16x16xf32>
    %cst_25 = arith.constant dense<0xFF800000> : vector<4x16xf32>
    %108 = vector.multi_reduction <maximumf>, %107, %cst_25 [2] : vector<4x16x16xf32> to vector<4x16xf32>
    %109 = vector.shape_cast %108 : vector<4x16xf32> to vector<4x16x1xf32>
    %110 = vector.broadcast %109 : vector<4x16x1xf32> to vector<4x16x16xf32>
    %111 = arith.subf %107, %110 : vector<4x16x16xf32>
    %112 = math.exp %111 : vector<4x16x16xf32>
    %cst_26 = arith.constant dense<0.000000e+00> : vector<4x16xf32>
    %113 = vector.multi_reduction <add>, %112, %cst_26 [2] : vector<4x16x16xf32> to vector<4x16xf32>
    %114 = vector.shape_cast %113 : vector<4x16xf32> to vector<4x16x1xf32>
    "tpu.trace_start"() <{level = 10 : i32, message = "hqk,hkd->hqd"}> : () -> ()
    %cst_27 = arith.constant dense<0.000000e+00> : vector<4x16x8xf32>
    %115 = tpu.matmul %112, %44, %cst_27 {dimension_numbers = #tpu.dot_dimension_numbers<[2], [1], [1], [2], [0, 0, 0, 1, 1, 2], [0], [0]>} : vector<4x16x16xf32>, vector<4x16x8xf32>, vector<4x16x8xf32> -> vector<4x16x8xf32>
    "tpu.trace_stop"() : () -> ()
    %116 = tpu.reciprocal %114 : vector<4x16x1xf32> -> vector<4x16x1xf32>
    %117 = vector.broadcast %116 : vector<4x16x1xf32> to vector<4x16x8xf32>
    %118 = arith.mulf %115, %117 : vector<4x16x8xf32>
    %119 = vector.extract_strided_slice %118 {offsets = [0, 0, 0], sizes = [1, 16, 8], strides = [1, 1, 1]} : vector<4x16x8xf32> to vector<1x16x8xf32>
    %120 = vector.shape_cast %119 : vector<1x16x8xf32> to vector<16x8xf32>
    %121 = vector.extract_strided_slice %118 {offsets = [1, 0, 0], sizes = [1, 16, 8], strides = [1, 1, 1]} : vector<4x16x8xf32> to vector<1x16x8xf32>
    %122 = vector.shape_cast %121 : vector<1x16x8xf32> to vector<16x8xf32>
    %123 = vector.extract_strided_slice %118 {offsets = [2, 0, 0], sizes = [1, 16, 8], strides = [1, 1, 1]} : vector<4x16x8xf32> to vector<1x16x8xf32>
    %124 = vector.shape_cast %123 : vector<1x16x8xf32> to vector<16x8xf32>
    %125 = vector.extract_strided_slice %118 {offsets = [3, 0, 0], sizes = [1, 16, 8], strides = [1, 1, 1]} : vector<4x16x8xf32> to vector<1x16x8xf32>
    %126 = vector.shape_cast %125 : vector<1x16x8xf32> to vector<16x8xf32>
    %127 = tpu.concatenate %120, %122, %124, %126 in 1 : vector<16x8xf32>, vector<16x8xf32>, vector<16x8xf32>, vector<16x8xf32> -> vector<16x32xf32>
    %cst_28 = arith.constant dense<0.000000e+00> : vector<16x32xf32>
    %128 = tpu.matmul %127, %4, %cst_28 {dimension_numbers = #tpu.dot_dimension_numbers<[1], [0], [0], [1], [0, 0, 1, 1], [], []>} : vector<16x32xf32>, vector<32x32xf32>, vector<16x32xf32> -> vector<16x32xf32>
    %129 = vector.shape_cast %10 : vector<32xf32> to vector<1x32xf32>
    %130 = vector.broadcast %129 : vector<1x32xf32> to vector<16x32xf32>
    %131 = arith.addf %128, %130 : vector<16x32xf32>
    %c0_29 = arith.constant 0 : index
    %c0_30 = arith.constant 0 : index
    %c0_31 = arith.constant 0 : index
    %132 = vector.load %arg8[%c0_29, %c0_30, %c0_31] : memref<1x16x32xf32, #tpu.memory_space<vmem>>, vector<1x16x32xf32>
    %133 = vector.shape_cast %132 : vector<1x16x32xf32> to vector<16x32xf32>
    %134 = vector.shape_cast %131 : vector<16x32xf32> to vector<1x16x32xf32>
    tpu.vector_store %arg8[%c0_29, %c0_30, %c0_31], %134 {strides = array<i32>} : memref<1x16x32xf32, #tpu.memory_space<vmem>>, vector<1x16x32xf32>,
    return
  }
  func.func @transform_0(%arg0: i32) -> (i32, i32, i32) {
    %c0_i32 = arith.constant 0 : i32
    %c0_i32_0 = arith.constant 0 : i32
    %c0_i32_1 = arith.constant 0 : i32
    return %arg0, %c0_i32, %c0_i32_0 : i32, i32, i32
  }
  func.func @transform_1(%arg0: i32) -> (i32, i32) {
    %c0_i32 = arith.constant 0 : i32
    %c0_i32_0 = arith.constant 0 : i32
    %c0_i32_1 = arith.constant 0 : i32
    return %c0_i32, %c0_i32_0 : i32, i32
  }
  func.func @transform_2(%arg0: i32) -> (i32, i32) {
    %c0_i32 = arith.constant 0 : i32
    %c0_i32_0 = arith.constant 0 : i32
    %c0_i32_1 = arith.constant 0 : i32
    return %c0_i32, %c0_i32_0 : i32, i32
  }
  func.func @transform_3(%arg0: i32) -> (i32, i32) {
    %c0_i32 = arith.constant 0 : i32
    %c0_i32_0 = arith.constant 0 : i32
    %c0_i32_1 = arith.constant 0 : i32
    return %c0_i32, %c0_i32_0 : i32, i32
  }
  func.func @transform_4(%arg0: i32) -> (i32, i32) {
    %c0_i32 = arith.constant 0 : i32
    %c0_i32_0 = arith.constant 0 : i32
    %c0_i32_1 = arith.constant 0 : i32
    return %c0_i32, %c0_i32_0 : i32, i32
  }
  func.func @transform_5(%arg0: i32) -> (i32, i32) {
    %c0_i32 = arith.constant 0 : i32
    %c0_i32_0 = arith.constant 0 : i32
    %c0_i32_1 = arith.constant 0 : i32
    return %c0_i32, %c0_i32_0 : i32, i32
  }
  func.func @transform_6(%arg0: i32) -> (i32, i32) {
    %c0_i32 = arith.constant 0 : i32
    %c0_i32_0 = arith.constant 0 : i32
    %c0_i32_1 = arith.constant 0 : i32
    return %c0_i32, %c0_i32_0 : i32, i32
  }
  func.func @transform_7(%arg0: i32) -> (i32, i32, i32) {
    %c0_i32 = arith.constant 0 : i32
    %c0_i32_0 = arith.constant 0 : i32
    %c0_i32_1 = arith.constant 0 : i32
    return %arg0, %c0_i32, %c0_i32_0 : i32, i32, i32
  }
}

</mosaic_0001>

<bundles_post_ra>
// kernel: tpu_custom_call.1
= control target key start
LH: loop header
LB: loop body
LE: loop exit
PB: predicated region body
PF: predicated region fallthrough
CT: control target
= control target key end

     0   :  { %12 = vsyncpa [#allocation3], 0  ;;  %s3470_s0 = inlined_call_operand.vmem [shape: f32[2,16,32], index: 0, kind: input, shape index: {}]   ;;  %s3471_s1 = inlined_call_operand.vmem [shape: f32[32,96], index: 1, kind: input, shape index: {}]   ;;  %s3472_s2 = inlined_call_operand.vmem [shape: f32[1,96], index: 2, kind: input, shape index: {}]   ;;  %s3473_s3 = inlined_call_operand.vmem [shape: f32[96,32], index: 3, kind: input, shape index: {}]   ;;  %s3474_s4 = inlined_call_operand.vmem [shape: f32[1,32], index: 4, kind: input, shape index: {}]   ;;  %s3475_s5 = inlined_call_operand.vmem [shape: f32[32,32], index: 5, kind: input, shape index: {}]   ;;  %s3476_s6 = inlined_call_operand.vmem [shape: f32[1,32], index: 6, kind: input, shape index: {}]   ;;  %s3477_s7 = inlined_call_operand.hbm [shape: f32[2,16,32], index: 7, kind: output, shape index: {}]  }
   0x1   :  { %14 = vsyncpa [#allocation3 + $0x1], 0  ;;  %s3030_s24 = smov 0   ;;  %s3032_s25 = smov 0  }
   0x2   :  { %s3034_s26 = smov 0   ;;  %s3036_s27 = smov 0  }
   0x3 LB: > { %s3051_s28 = sadd.s32 4294967295, %s2977_s27   ;;  %s2320_s29 = sadd.s32 4294967294, %s2977_s27   ;;  %s2977_s27 = sphi %s3036_s27, %s3489_s27   ;;  %s2973_s26 = sphi %s3034_s26, %s3488_s26   ;;  %s2969_s25 = sphi %s3032_s25, %s3487_s25   ;;  %s2965_s24 = sphi %s3030_s24, %s3486_s24  }
   0x4   : > { %s3055_s30 = sadd.s32 1, %s2977_s27   ;;  %s179_s8 = sadd.s32 1, %s2973_s26 }
   0x5   : > { %s176_s9 = ssub.s32 %s2977_s27, %s3055_s30  ;;  %p189_p0 = scmp.ne.s32.totalorder %s2973_s26, %s2969_s25 }
   0x6   : > { %p177_p1 = scmp.eq.s32.totalorder %s176_s9, 0  ;;  %p190_p2 = scmp.eq.s32.totalorder %s3051_s28, 1 }
   0x7   : > { %p195_p3 = scmp.ne.s32.totalorder %s2969_s25, %s2965_s24  ;;  %p196_p4 = scmp.eq.s32.totalorder %s2320_s29, 1 }
   0x8   : > { %s3066_s10 = scalar_select %p177_p1, %s2973_s26, %s179_s8  }
   0x9   : > { %p3068_p5 = por %p190_p2, %p189_p0  ;;  %p3072_p6 = por %p196_p4, %p195_p3 }
   0xa   : > { %p2323_p7 = scmp.ge.s32.totalorder %s2977_s27, 1  ;;  %p240_p8 = scmp.lt.s32.totalorder %s2977_s27, 3 }
   0xc   : > { %p241_p9 = pnand %p2323_p7, %p240_p8 }
   0xd   : > { %v279_v0 = vld [vmem:[%s3471_s1] sm:$0xff] (!%p241_p9)  ;;  %v280_v1 = vld [vmem:[%s3471_s1 + $0x8] sm:$0xff] (!%p241_p9)  ;;  %v281_v2 = vld [vmem:[%s3471_s1 + $0x10] sm:$0xff] (!%p241_p9)  ;;  %p272_p10 = scmp.lt.s32.totalorder (!%p241_p9), %s3051_s28, 1  ;;  %vm308_vm0 = vcmask (!%p241_p9), 261120   ;;  %vm415_vm1 = vcmask (!%p241_p9), 64512   ;;  %v404_v62 = vlaneseq (!%p241_p9) }
   0xe   : > { %244 = sbr.rel (%p241_p9) target bundleno = 2647 (0xa57), region = 48  ;;  %v2642_v3 = vpack.c.bf16 (!%p241_p9), %v280_v1, %v279_v0  ;;  %v282_v4 = vld [vmem:[%s3471_s1 + $0x18] sm:$0xff] (!%p241_p9)  ;;  %v2327_v8 = vld [vmem:[%s3472_s2] ss:$0 sm:$0xff] (!%p241_p9)  ;;  %s2979_s14 = smov (!%p241_p9), 112   ;;  %vm3119_vm2 = vmpackc.low (!%p241_p9), %vm415_vm1, %vm415_vm1  ;;  %vm772_vm5 = vcmask (!%p241_p9), 130048  }
   0xf   : > { %v2646_v5 = vpack.c.bf16 (!%p241_p9), %v282_v4, %v281_v2  ;;  %s2980_s15 = smov (!%p241_p9), 120   ;;  %s2981_s16 = smov (!%p241_p9), 104   ;;  %v283_v41 = vld [vmem:[%s3473_s3] sm:$0xff] (!%p241_p9)  ;;  %v284_v42 = vld [vmem:[%s3473_s3 + $0x8] sm:$0xff] (!%p241_p9)  ;;  %v285_v47 = vld [vmem:[%s3473_s3 + $0x10] sm:$0xff] (!%p241_p9)  ;;  %v3205_v63 = vshrl.u32 (!%p241_p9), %v404_v62, 7 }
  0x10   : > { %2643 = vmatprep.subr.bf16.mxu0 (!%p241_p9), %v2642_v3  ;;  %s2982_s17 = smov (!%p241_p9), 96   ;;  %s2983_s18 = smov (!%p241_p9), 64   ;;  %v2690_v46 = vpack.c.bf16 (!%p241_p9), %v284_v42, %v283_v41  ;;  %v286_v48 = vld [vmem:[%s3473_s3 + $0x18] sm:$0xff] (!%p241_p9)  ;;  %v287_v50 = vld [vmem:[%s3473_s3 + $0x20] sm:$0xff] (!%p241_p9)  ;;  %v288_v51 = vld [vmem:[%s3473_s3 + $0x28] sm:$0xff] (!%p241_p9)  ;;  %v408_v1 = vand.u32 (!%p241_p9), 127, %v404_v62 }
  0x11   : > { %2645 = vmatpush3.bf16.msra.mxu0 (!%p241_p9), %v2642_v3  ;;  %v2694_v49 = vpack.c.bf16 (!%p241_p9), %v286_v48, %v285_v47  ;;  %v2698_v52 = vpack.c.bf16 (!%p241_p9), %v288_v51, %v287_v50  ;;  %v289_v53 = vld [vmem:[%s3473_s3 + $0x30] sm:$0xff] (!%p241_p9)  ;;  %v290_v54 = vld [vmem:[%s3473_s3 + $0x38] sm:$0xff] (!%p241_p9)  ;;  %v291_v56 = vld [vmem:[%s3473_s3 + $0x40] sm:$0xff] (!%p241_p9)  ;;  %v3208_v0 = vadd.s32 (!%p241_p9), 8, %v3205_v63  ;;  %s2984_s23 = smov (!%p241_p9), 8   ;;  %s2985_s29 = smov (!%p241_p9), 16  }
  0x12   : > { %2647 = vmatprep.subr.bf16.mxu0 (!%p241_p9), %v2646_v5  ;;  %v2702_v55 = vpack.c.bf16 (!%p241_p9), %v290_v54, %v289_v53  ;;  %v292_v57 = vld [vmem:[%s3473_s3 + $0x48] sm:$0xff] (!%p241_p9)  ;;  %v293_v59 = vld [vmem:[%s3473_s3 + $0x50] sm:$0xff] (!%p241_p9)  ;;  %v294_v60 = vld [vmem:[%s3473_s3 + $0x58] sm:$0xff] (!%p241_p9)  ;;  %vm3216_vm4 = vcmp.ge.s32.totalorder (!%p241_p9), %v3205_v63, %v408_v1  ;;  %vm1237_vm6 = vcmask (!%p241_p9), 195584   ;;  %vm1257_vm7 = vcmp.lt.s32.totalorder (!%p241_p9), %v3205_v63, 7  ;;  %s2987_s9 = smov (!%p241_p9), 32  }
  0x13   : > { %v2706_v58 = vpack.c.bf16 (!%p241_p9), %v292_v57, %v291_v56  ;;  %v2710_v61 = vpack.c.bf16 (!%p241_p9), %v294_v60, %v293_v59  ;;  %vm3211_vm3 = vcmp.ge.s32.totalorder (!%p241_p9), %v3208_v0, %v408_v1  ;;  %vm1244_vm8 = vcmp.lt.s32.totalorder (!%p241_p9), %v3205_v63, 1 }
  0x14   : > { %vm1254_vm9 = vcmp.eq.s32.totalorder (!%p241_p9), %v3208_v0, 15  ;;  %vm1240_vm10 = vcmp.eq.s32.totalorder (!%p241_p9), %v3205_v63, 0  ;;  %vm1284_vm11 = vcmask (!%p241_p9), 523264   ;;  %vm1293_vm12 = vcmask (!%p241_p9), 785408   ;;  %v2354_v63 = vld [vmem:[%s3474_s4] ss:$0 sm:$0xff] (!%p241_p9) }
  0x15   : > { %s273_s21 = scalar_select %p272_p10, %s3051_s28, 1  ;;  %2649 = vmatpush3.bf16.msra.mxu0 %v2646_v5 }
  0x17   : > { %s2389_s22 = sshll.u32 %s273_s21, 4  ;;  %s2988_s21 = smov [#allocation2]  }
  0x18   : > { %s276_s8 = scalar_lea.vmem %s3470_s0, %s2389_s22  ;;  %s2919_s22 = sshll.u32 %s2988_s21, 4  ;;  %s2920_s22 = int_to_ptr.vmem [resolvable:$false] %s2919_s22 }
  0x19   : > { %v277_v6 = vld [vmem:[%s276_s8] sm:$0xff]  ;;  %v278_v7 = vld [vmem:[%s276_s8 + $0x8] sm:$0xff]  ;;  %s2986_s8 = smov 24  }
  0x1a   : > { %2489 = vmatprep.mubr.msk.f32.mxu0 %vm308_vm0, %v277_v6 }
  0x1b   : > { %2490 = vmatmul.mubr.msk.f32.vlgmr.msra.gmra.mrb[0].mxu0 %vm308_vm0, %v278_v7 }
  0xee   : > { %v2491_v9 = vpop.f32.mrb[0].mxu0 }
  0xef   : > { %v387_v10 = vadd.f32 %v2491_v9, %v2327_v8  ;;  %v381_v11 = vpop.f32.mrb[1].mxu0 }
  0xf0   : > { %v382_v12 = vadd.f32 %v2327_v8, %v381_v11 }
  0xf1   : > { %398 = vrot.lane.b32.xlu1 %v387_v10, %s2979_s14 }
  0xf2   : > { %392 = vrot.lane.b32.xlu0 %v382_v12, %s2980_s15  ;;  %2496 = vmatprep.mubr.msk.f32.mxu1 %vm415_vm1, %v382_v12  ;;  %v2811_v13 = vpack.i.bf16 %v387_v10, %v382_v12 }
  0xf5   : > { %396 = vrot.lane.b32.xlu1 %v382_v12, %s2979_s14 }
  0xf6   : > { %394 = vrot.lane.b32.xlu0 %v387_v10, %s2980_s15 }
  0xf9   : > { %402 = vrot.lane.b32.xlu1 %v387_v10, %s2981_s16 }
  0xfa   : > { %400 = vrot.lane.b32.xlu0 %v382_v12, %s2981_s16 }
  0xfe   : > { %2812 = vrot.lane.b32.xlu0 %v2811_v13, %s2982_s17 }
 0x163   : > { %v399_v14 = vpop.permute.xlu1 %398 }
 0x164   : > { %v393_v15 = vpop.permute.xlu0 %392 }
 0x165   : > { %2503 = vmatprep.mubr.msk.f32.mxu0 %vm415_vm1, %v393_v15 }
 0x167   : > { %v397_v16 = vpop.permute.xlu1 %396 }
 0x168   : > { %v3108_v17 = vpack.i.bf16 %v399_v14, %v397_v16  ;;  %v395_v18 = vpop.permute.xlu0 %394 }
 0x169   : > { %v3110_v19 = vpack.i.bf16 %v395_v18, %v393_v15 }
 0x16a   : > { %2822 = vrot.lane.b32.xlu0 %v3108_v17, %s2982_s17 }
 0x16b   : > { %v403_v20 = vpop.permute.xlu1 %402  ;;  %2817 = vrot.lane.b32.xlu1 %v3110_v19, %s2982_s17 }
 0x16c   : > { %v401_v21 = vpop.permute.xlu0 %400 }
 0x16d   : > { %v3114_v22 = vpack.i.bf16 %v403_v20, %v401_v21 }
 0x16f   : > { %2827 = vrot.lane.b32.xlu1 %v3114_v22, %s2982_s17 }
 0x170   : > { %v2813_v23 = vpop.permute.xlu0 %2812 }
 0x171   : > { %v2815_v24 = vunpack.i.h.bf16 %v2813_v23  ;;  %v2814_v25 = vunpack.i.l.bf16 %v2813_v23 }
 0x173   : > { %v3123_v27 = vpack.c.bf16 %v2815_v24, %v2814_v25  ;;  %2832 = vrot.lane.b32.xlu1 %v2811_v13, %s2983_s18 }
 0x175   : > { %2652 = vmatprep.subr.msk.bf16.mxu1 %vm3119_vm2, %v3123_v27 }
 0x176   : > { %2655 = vmatpush3.bf16.xpose.msk.msra.mxu1 %vm3119_vm2, %v3123_v27 }
 0x17d   : > { %2497 = vmatmul.mubr.msk.f32.vlgmr.msra.gmra.mrb[0].mxu1 %vm415_vm1, %v387_v10 }
 0x17e   : > { %2510 = vmatprep.mubr.msk.f32.mxu1 %vm415_vm1, %v397_v16 }
 0x1dc   : > { %v2823_v28 = vpop.permute.xlu0 %2822 }
 0x1dd   : > { %v2825_v29 = vunpack.i.h.bf16 %v2823_v28  ;;  %v2824_v30 = vunpack.i.l.bf16 %v2823_v28  ;;  %v2818_v31 = vpop.permute.xlu1 %2817 }
 0x1de   : > { %v2820_v32 = vunpack.i.h.bf16 %v2818_v31  ;;  %v2819_v33 = vunpack.i.l.bf16 %v2818_v31 }
 0x1df   : > { %v3134_v34 = vpack.c.bf16 %v2825_v29, %v2824_v30 }
 0x1e0   : > { %v3136_v35 = vpack.c.bf16 %v2820_v32, %v2819_v33 }
 0x1e1   : > { %v2828_v36 = vpop.permute.xlu1 %2827  ;;  %2664 = vmatprep.subr.msk.bf16.mxu1 %vm3119_vm2, %v3134_v34 }
 0x1e2   : > { %v2830_v37 = vunpack.i.h.bf16 %v2828_v36  ;;  %v2829_v38 = vunpack.i.l.bf16 %v2828_v36  ;;  %2658 = vmatprep.subr.msk.bf16.mxu0 %vm3119_vm2, %v3136_v35  ;;  %2667 = vmatpush3.bf16.xpose.msk.msra.mxu1 %vm3119_vm2, %v3134_v34 }
 0x1e3   : > { %2661 = vmatpush3.bf16.xpose.msk.msra.mxu0 %vm3119_vm2, %v3136_v35 }
 0x1e4   : > { %v3150_v39 = vpack.c.bf16 %v2830_v37, %v2829_v38 }
 0x1e5   : > { %v2833_v40 = vpop.permute.xlu1 %2832 }
 0x1e6   : > { %v2835_v43 = vunpack.i.h.bf16 %v2833_v40  ;;  %v2834_v44 = vunpack.i.l.bf16 %v2833_v40  ;;  %2670 = vmatprep.subr.msk.bf16.mxu0 %vm3119_vm2, %v3150_v39 }
 0x1e8   : > { %v3161_v45 = vpack.c.bf16 %v2835_v43, %v2834_v44 }
 0x1e9   : > { %2511 = vmatmul.mubr.msk.f32.vlgmr.msra.gmra.mrb[2].mxu1 %vm415_vm1, %v399_v14 }
 0x1ea   : > { %2504 = vmatmul.mubr.msk.f32.vlgmr.msra.gmra.mrb[2].mxu0 %vm415_vm1, %v395_v18  ;;  %2675 = vmatprep.subr.bf16.mxu1 %v3161_v45 }
 0x1eb   : > { %2673 = vmatpush3.bf16.xpose.msk.msra.mxu0 %vm3119_vm2, %v3150_v39  ;;  %2517 = vmatprep.mubr.msk.f32.mxu0 %vm415_vm1, %v401_v21 }
 0x1ec   : > { %2677 = vmatpush3.bf16.msra.mxu1 %v3161_v45  ;;  %2691 = vmatprep.subr.bf16.mxu0 %v2690_v46 }
 0x1f2   : > { %2518 = vmatmul.mubr.msk.f32.vlgmr.msra.gmra.mrb[4].mxu0 %vm415_vm1, %v403_v20 }
 0x1f3   : > { %2693 = vmatpush3.bf16.msra.mxu0 %v2690_v46 }
 0x1f4   : > { %2695 = vmatprep.subr.bf16.mxu0 %v2694_v49 }
 0x1f7   : > { %2697 = vmatpush3.bf16.msra.mxu0 %v2694_v49 }
 0x1f8   : > { %2699 = vmatprep.subr.bf16.mxu0 %v2698_v52 }
 0x1fb   : > { %2701 = vmatpush3.bf16.msra.mxu0 %v2698_v52 }
 0x1fc   : > { %2703 = vmatprep.subr.bf16.mxu0 %v2702_v55 }
 0x1ff   : > { %2705 = vmatpush3.bf16.msra.mxu0 %v2702_v55 }
 0x200   : > { %2707 = vmatprep.subr.bf16.mxu0 %v2706_v58 }
 0x203   : > { %2709 = vmatpush3.bf16.msra.mxu0 %v2706_v58 }
 0x204   : > { %2711 = vmatprep.subr.bf16.mxu0 %v2710_v61 }
 0x207   : > { %2713 = vmatpush3.bf16.msra.mxu0 %v2710_v61 }
 0x208   : > { %2734 = vmatprep.subr.msk.bf16.mxu0 %vm3119_vm2, %v3150_v39 }
 0x250   : > { %v2498_v4 = vpop.f32.mrb[0].mxu1 }
 0x251   : > { %v765_v5 = vsel %vm3211_vm3, %v2498_v4, -inf  ;;  %v490_v6 = vpop.f32.mrb[1].mxu1 }
 0x252   : > { %v764_v7 = vsel %vm3216_vm4, %v490_v6, -inf  ;;  %v776_v8 = vsel %vm772_vm5, %v765_v5, -inf }
 0x253   : > { %777 = vmax.xlane.f32.xlu1 %v776_v8  ;;  %v773_v9 = vsel %vm772_vm5, %v764_v7, -inf }
 0x254   : > { %774 = vmax.xlane.f32.xlu0 %v773_v9 }
 0x2bc   : > { %v2512_v10 = vpop.f32.mrb[2].mxu1 }
 0x2bd   : > { %v2505_v11 = vpop.f32.mrb[2].mxu0  ;;  %v664_v12 = vpop.f32.mrb[3].mxu1  ;;  %v769_v20 = vsel %vm3211_vm3, %v2512_v10, -inf }
 0x2be   : > { %v767_v13 = vsel %vm3211_vm3, %v2505_v11, -inf  ;;  %v768_v14 = vsel %vm3216_vm4, %v664_v12, -inf  ;;  %v577_v15 = vpop.f32.mrb[3].mxu0  ;;  %v788_v21 = vsel %vm772_vm5, %v769_v20, -inf }
 0x2bf   : > { %v782_v16 = vsel %vm772_vm5, %v767_v13, -inf  ;;  %v785_v18 = vsel %vm772_vm5, %v768_v14, -inf  ;;  %v766_v23 = vsel %vm3216_vm4, %v577_v15, -inf }
 0x2c0   : > { %783 = vmax.xlane.f32.xlu0 %v782_v16  ;;  %786 = vmax.xlane.f32.xlu1 %v785_v18  ;;  %v779_v28 = vsel %vm772_vm5, %v766_v23, -inf }
 0x2c4   : > { %789 = vmax.xlane.f32.xlu0 %v788_v21 }
 0x2c5   : > { %v2519_v24 = vpop.f32.mrb[4].mxu0 }
 0x2c6   : > { %v751_v25 = vpop.f32.mrb[5].mxu0  ;;  %v771_v29 = vsel %vm3211_vm3, %v2519_v24, -inf }
 0x2c7   : > { %v794_v30 = vsel %vm772_vm5, %v771_v29, -inf  ;;  %v770_v42 = vsel %vm3216_vm4, %v751_v25, -inf }
 0x2c8   : > { %780 = vmax.xlane.f32.xlu0 %v779_v28 }
 0x2cc   : > { %795 = vmax.xlane.f32.xlu0 %v794_v30 }
 0x2d1   : > { %2842 = vrot.lane.b32.xlu1 %v3108_v17, %s2983_s18  ;;  %v791_v17 = vsel %vm772_vm5, %v770_v42, -inf }
 0x2e0   : > { %v778_v31 = vpop.xlane.xlu1 %777 }
 0x2e1   : > { %v798_v32 = vsub.f32 %v765_v5, %v778_v31  ;;  %v775_v33 = vpop.xlane.xlu0 %774 }
 0x2e2   : > { %v797_v36 = vsub.f32 %v764_v7, %v775_v33  ;;  %2837 = vrot.lane.b32.xlu0 %v3110_v19, %s2983_s18 }
 0x2e3   : > { %v807_v37 = vmul.f32 1.442695, %v798_v32 }
 0x2e4   : > { %v805_v38 = vmul.f32 1.442695, %v797_v36 }
 0x2e6   : > { %2851 = vpow2.f32 %v805_v38 }
 0x2e7   : > { %2853 = vpow2.f32 %v807_v37 }
 0x2f0   : > { %v3245_v40 = vpop.eup %2851 }
 0x2f1   : > { %v2854_v41 = vpop.eup %2853  ;;  %2524 = vmatprep.mubr.msk.f32.mxu1 %vm772_vm5, %v3245_v40  ;;  %v821_v30 = vsel %vm772_vm5, %v3245_v40, 0.0 }
 0x2f2   : > { %2525 = vmatmul.mubr.msk.f32.vlgmr.msra.gmra.mrb[4].mxu1 %vm772_vm5, %v2854_v41  ;;  %v824_v15 = vsel %vm772_vm5, %v2854_v41, 0.0 }
 0x2f5   : > { %792 = vmax.xlane.f32.xlu1 %v791_v17 }
 0x306   : > { %2847 = vrot.lane.b32.xlu1 %v3114_v22, %s2983_s18 }
 0x34d   : > { %v784_v19 = vpop.xlane.xlu0 %783  ;;  %v787_v46 = vpop.xlane.xlu1 %786 }
 0x34e   : > { %v800_v43 = vsub.f32 %v767_v13, %v784_v19  ;;  %v801_v49 = vsub.f32 %v768_v14, %v787_v46 }
 0x350   : > { %v811_v44 = vmul.f32 1.442695, %v800_v43  ;;  %v813_v53 = vmul.f32 1.442695, %v801_v49 }
 0x351   : > { %v790_v47 = vpop.xlane.xlu0 %789  ;;  %v2843_v57 = vpop.permute.xlu1 %2842 }
 0x352   : > { %2855 = vpow2.f32 %v811_v44  ;;  %v802_v48 = vsub.f32 %v769_v20, %v790_v47  ;;  %v2845_v61 = vunpack.i.h.bf16 %v2843_v57  ;;  %v2844_v62 = vunpack.i.l.bf16 %v2843_v57 }
 0x354   : > { %v815_v50 = vmul.f32 1.442695, %v802_v48  ;;  %v3259_v8 = vpack.c.bf16 %v2845_v61, %v2844_v62 }
 0x355   : > { %v781_v51 = vpop.xlane.xlu0 %780 }
 0x356   : > { %2857 = vpow2.f32 %v815_v50  ;;  %v799_v52 = vsub.f32 %v766_v23, %v781_v51 }
 0x358   : > { %v809_v54 = vmul.f32 1.442695, %v799_v52 }
 0x359   : > { %v796_v55 = vpop.xlane.xlu0 %795 }
 0x35a   : > { %2859 = vpow2.f32 %v809_v54  ;;  %v804_v56 = vsub.f32 %v771_v29, %v796_v55 }
 0x35b   : > { %2861 = vpow2.f32 %v813_v53 }
 0x35c   : > { %v2856_v58 = vpop.eup %2855  ;;  %v819_v22 = vmul.f32 1.442695, %v804_v56 }
 0x35d   : > { %v2838_v59 = vpop.permute.xlu0 %2837  ;;  %v830_v60 = vsel %vm772_vm5, %v2856_v58, 0.0 }
 0x35e   : > { %v2840_v1 = vunpack.i.h.bf16 %v2838_v59  ;;  %v2839_v4 = vunpack.i.l.bf16 %v2838_v59  ;;  %831 = vadd.xlane.f32.xlu1 %v830_v60  ;;  %2863 = vpow2.f32 %v819_v22 }
 0x360   : > { %v2858_v5 = vpop.eup %2857  ;;  %v3256_v6 = vpack.c.bf16 %v2840_v1, %v2839_v4 }
 0x361   : > { %v836_v7 = vsel %vm772_vm5, %v2858_v5, 0.0 }
 0x362   : > { %837 = vadd.xlane.f32.xlu0 %v836_v7  ;;  %2679 = vmatprep.subr.bf16.mxu1 %v3256_v6 }
 0x363   : > { %2681 = vmatpush3.bf16.msra.mxu1 %v3256_v6 }
 0x364   : > { %v2860_v9 = vpop.eup %2859  ;;  %2683 = vmatprep.subr.bf16.mxu1 %v3259_v8 }
 0x365   : > { %2531 = vmatprep.mubr.msk.f32.mxu1 %vm772_vm5, %v2860_v9  ;;  %v827_v10 = vsel %vm772_vm5, %v2860_v9, 0.0  ;;  %v2862_v11 = vpop.eup %2861 }
 0x366   : > { %828 = vadd.xlane.f32.xlu0 %v827_v10  ;;  %2532 = vmatmul.mubr.msk.f32.vlgmr.msra.gmra.mrb[6].mxu1 %vm772_vm5, %v2856_v58  ;;  %v833_v12 = vsel %vm772_vm5, %v2862_v11, 0.0 }
 0x367   : > { %2685 = vmatpush3.bf16.msra.mxu1 %v3259_v8  ;;  %2538 = vmatprep.mubr.msk.f32.mxu1 %vm772_vm5, %v2862_v11 }
 0x368   : > { %v2864_v13 = vpop.eup %2863 }
 0x369   : > { %v842_v14 = vsel %vm772_vm5, %v2864_v13, 0.0 }
 0x36a   : > { %834 = vadd.xlane.f32.xlu0 %v833_v12  ;;  %2539 = vmatmul.mubr.msk.f32.vlgmr.msra.gmra.mrb[8].mxu1 %vm772_vm5, %v2858_v5 }
 0x36e   : > { %843 = vadd.xlane.f32.xlu0 %v842_v14 }
 0x372   : > { %825 = vadd.xlane.f32.xlu0 %v824_v15 }
 0x382   : > { %v793_v16 = vpop.xlane.xlu1 %792 }
 0x383   : > { %v803_v18 = vsub.f32 %v770_v42, %v793_v16 }
 0x385   : > { %v817_v20 = vmul.f32 1.442695, %v803_v18 }
 0x386   : > { %v2848_v21 = vpop.permute.xlu1 %2847 }
 0x387   : > { %2865 = vpow2.f32 %v817_v20  ;;  %v2850_v23 = vunpack.i.h.bf16 %v2848_v21  ;;  %v2849_v24 = vunpack.i.l.bf16 %v2848_v21 }
 0x389   : > { %v3273_v25 = vpack.c.bf16 %v2850_v23, %v2849_v24 }
 0x38b   : > { %2687 = vmatprep.subr.bf16.mxu1 %v3273_v25 }
 0x38c   : > { %2689 = vmatpush3.bf16.msra.mxu1 %v3273_v25 }
 0x38d   : > { %2716 = vmatprep.subr.msk.bf16.mxu1 %vm3119_vm2, %v3123_v27 }
 0x391   : > { %v2866_v28 = vpop.eup %2865 }
 0x392   : > { %2545 = vmatprep.mubr.msk.f32.mxu1 %vm772_vm5, %v2866_v28  ;;  %v839_v29 = vsel %vm772_vm5, %v2866_v28, 0.0 }
 0x393   : > { %840 = vadd.xlane.f32.xlu1 %v839_v29  ;;  %2546 = vmatmul.mubr.msk.f32.vlgmr.msra.gmra.mrb[10].mxu1 %vm772_vm5, %v2864_v13 }
 0x395   : > { %2719 = vmatpush3.bf16.xpose.msk.msra.mxu1 %vm3119_vm2, %v3123_v27 }
 0x396   : > { %2722 = vmatprep.subr.msk.bf16.mxu1 %vm3119_vm2, %v3136_v35 }
 0x397   : > { %822 = vadd.xlane.f32.xlu1 %v821_v30 }
 0x3c5   : > { %v2526_v31 = vpop.f32.mrb[4].mxu1 }
 0x3c6   : > { %v923_v32 = vpop.f32.mrb[5].mxu1 }
 0x3eb   : > { %v832_v36 = vpop.xlane.xlu1 %831 }
 0x3ec   : > { %2867 = vrcp.f32 %v832_v36 }
 0x3ef   : > { %v838_v33 = vpop.xlane.xlu0 %837 }
 0x3f3   : > { %v829_v37 = vpop.xlane.xlu0 %828 }
 0x3f4   : > { %2869 = vrcp.f32 %v829_v37 }
 0x3f5   : > { %2871 = vrcp.f32 %v838_v33 }
 0x3f6   : > { %v2868_v41 = vpop.eup %2867 }
 0x3f7   : > { %v835_v38 = vpop.xlane.xlu0 %834 }
 0x3f8   : > { %2873 = vrcp.f32 %v835_v38 }
 0x3fb   : > { %v844_v50 = vpop.xlane.xlu0 %843 }
 0x3fc   : > { %2875 = vrcp.f32 %v844_v50 }
 0x3fe   : > { %v2870_v42 = vpop.eup %2869 }
 0x3ff   : > { %v2872_v40 = vpop.eup %2871  ;;  %v826_v22 = vpop.xlane.xlu0 %825 }
 0x402   : > { %v2874_v48 = vpop.eup %2873 }
 0x406   : > { %v2876_v52 = vpop.eup %2875 }
 0x420   : > { %v841_v51 = vpop.xlane.xlu1 %840 }
 0x421   : > { %2877 = vrcp.f32 %v841_v51 }
 0x422   : > { %2879 = vrcp.f32 %v826_v22 }
 0x424   : > { %v823_v58 = vpop.xlane.xlu1 %822 }
 0x425   : > { %2881 = vrcp.f32 %v823_v58 }
 0x42b   : > { %v2878_v54 = vpop.eup %2877 }
 0x42c   : > { %v2880_v61 = vpop.eup %2879 }
 0x42d   : > { %v1202_v5 = vmul.f32 %v2880_v61, %v2526_v31 }
 0x42f   : > { %v2882_v62 = vpop.eup %2881 }
 0x430   : > { %v1201_v7 = vmul.f32 %v2882_v62, %v923_v32 }
 0x439   : > { %v2533_v27 = vpop.f32.mrb[6].mxu1 }
 0x43a   : > { %v1204_v17 = vmul.f32 %v2868_v41, %v2533_v27  ;;  %v1010_v19 = vpop.f32.mrb[7].mxu1 }
 0x43b   : > { %v1203_v43 = vmul.f32 %v2870_v42, %v1010_v19 }
 0x43c   : > { %1213 = vrot.lane.b32.xlu0 %v1204_v17, %s2984_s23 }
 0x43d   : > { %1211 = vrot.lane.b32.xlu1 %v1203_v43, %s2984_s23  ;;  %v2540_v44 = vpop.f32.mrb[8].mxu1 }
 0x43e   : > { %v1206_v46 = vmul.f32 %v2872_v40, %v2540_v44  ;;  %v1097_v47 = vpop.f32.mrb[9].mxu1 }
 0x43f   : > { %v1205_v49 = vmul.f32 %v2874_v48, %v1097_v47 }
 0x441   : > { %1221 = vrot.lane.b32.xlu1 %v1206_v46, %s2985_s29 }
 0x445   : > { %1219 = vrot.lane.b32.xlu1 %v1205_v49, %s2985_s29 }
 0x466   : > { %v2547_v53 = vpop.f32.mrb[10].mxu1 }
 0x467   : > { %v1208_v55 = vmul.f32 %v2876_v52, %v2547_v53  ;;  %v1184_v56 = vpop.f32.mrb[11].mxu1 }
 0x468   : > { %v1207_v57 = vmul.f32 %v2878_v54, %v1184_v56 }
 0x469   : > { %1229 = vrot.lane.b32.xlu1 %v1208_v55, %s2986_s8 }
 0x46a   : > { %1227 = vrot.lane.b32.xlu0 %v1207_v57, %s2986_s8 }
 0x4ae   : > { %v1214_v1 = vpop.permute.xlu0 %1213 }
 0x4af   : > { %v1212_v59 = vpop.permute.xlu1 %1211  ;;  %v1234_v9 = vsel %vm415_vm1, %v1202_v5, %v1214_v1 }
 0x4b0   : > { %v1233_v10 = vsel %vm415_vm1, %v1201_v7, %v1212_v59 }
 0x4b3   : > { %v1222_v60 = vpop.permute.xlu1 %1221 }
 0x4b4   : > { %v1236_v11 = vsel %vm772_vm5, %v1234_v9, %v1222_v60 }
 0x4b7   : > { %v1220_v4 = vpop.permute.xlu1 %1219 }
 0x4b8   : > { %v1235_v13 = vsel %vm772_vm5, %v1233_v10, %v1220_v4 }
 0x4db   : > { %v1230_v12 = vpop.permute.xlu1 %1229 }
 0x4dc   : > { %v1228_v14 = vpop.permute.xlu0 %1227  ;;  %v1239_v15 = vsel %vm1237_vm6, %v1236_v11, %v1230_v12 }
 0x4dd   : > { %1270 = vrot.lane.b32.xlu1 %v1239_v15, %s2987_s9  ;;  %v1243_v16 = vrot.slane %v1239_v15, 7  ;;  %v1256_v18 = vrot.slane %v1239_v15, 1  ;;  %v1238_v20 = vsel %vm1237_vm6, %v1235_v13, %v1228_v14 }
 0x4de   : > { %1268 = vrot.lane.b32.xlu0 %v1238_v20, %s2987_s9  ;;  %v1242_v21 = vrot.slane %v1238_v20, 7  ;;  %v1255_v23 = vrot.slane %v1238_v20, 1 }
 0x4e0   : > { %v1259_v24 = vsel %vm1257_vm7, %v1256_v18, %v1255_v23  ;;  %v1258_v28 = vsel %vm1257_vm7, %v1255_v23, %v1256_v18  ;;  %v1245_v29 = vsel %vm1244_vm8, %v1242_v21, %v1243_v16  ;;  %v1246_v30 = vsel %vm1244_vm8, %v1243_v16, %v1242_v21 }
 0x4e1   : > { %v1265_v31 = vsel %vm1254_vm9, 0.0, %v1259_v24  ;;  %v1251_v36 = vsel %vm1240_vm10, 0.0, %v1246_v30 }
 0x4e2   : > { %1278 = vrot.lane.b32.xlu1 %v1265_v31, %s2983_s18  ;;  %1276 = vrot.lane.b32.xlu0 %v1258_v28, %s2983_s18 }
 0x54f   : > { %v1271_v32 = vpop.permute.xlu1 %1270 }
 0x550   : > { %v1269_v33 = vpop.permute.xlu0 %1268  ;;  %v1283_v37 = vsel %vm308_vm0, %v1245_v29, %v1271_v32 }
 0x551   : > { %v1282_v0 = vsel %vm308_vm0, %v1251_v36, %v1269_v33 }
 0x554   : > { %v1279_v38 = vpop.permute.xlu1 %1278  ;;  %v1277_v41 = vpop.permute.xlu0 %1276 }
 0x555   : > { %v1286_v27 = vsel %vm1284_vm11, %v1283_v37, %v1279_v38  ;;  %v1285_v42 = vsel %vm1284_vm11, %v1282_v0, %v1277_v41 }
 0x556   : > { %2572 = vmatprep.mubr.msk.f32.mxu0 %vm1293_vm12, %v1285_v42 }
 0x557   : > { %2573 = vmatmul.mubr.msk.f32.vlgmr.msra.gmra.mrb[6].mxu0 %vm1293_vm12, %v1286_v27 }
 0x558   : > { %2737 = vmatpush3.bf16.xpose.msk.msra.mxu0 %vm3119_vm2, %v3150_v39 }
 0x559   : > { %2747 = vmatprep.subr.bf16.mxu0 %v3259_v8 }
 0x62a   : > { %v2574_v17 = vpop.f32.mrb[6].mxu0 }
 0x62b   : > { %v1372_v19 = vadd.f32 %v2574_v17, %v2354_v63  ;;  %v1366_v43 = vpop.f32.mrb[7].mxu0 }
 0x62c   : > { %v1367_v40 = vadd.f32 %v2354_v63, %v1366_v43 }
 0x62d   : > { %1379 = vrot.lane.b32.xlu1 %v1372_v19, %s2980_s15 }
 0x62e   : > { %1377 = vrot.lane.b32.xlu0 %v1367_v40, %s2980_s15  ;;  %2579 = vmatprep.mubr.msk.f32.mxu1 %vm415_vm1, %v1367_v40  ;;  %s2390_s15 = sshll.u32 %s3051_s28, 8 }
 0x62f   : > { %2580 = vmatmul.mubr.msk.f32.vlgmr.msra.gmra.mrb[12].mxu1 %vm415_vm1, %v1372_v19  ;;  %s3424_s19 = scalar_lea.hbm %s3477_s7, %s2390_s15 }
 0x630   : > { %2725 = vmatpush3.bf16.xpose.msk.msra.mxu1 %vm3119_vm2, %v3136_v35 }
 0x631   : > { %2728 = vmatprep.subr.msk.bf16.mxu1 %vm3119_vm2, %v3134_v34  ;;  %1383 = vrot.lane.b32.xlu1 %v1372_v19, %s2979_s14 }
 0x632   : > { %1381 = vrot.lane.b32.xlu0 %v1367_v40, %s2979_s14 }
 0x635   : > { %1387 = vrot.lane.b32.xlu1 %v1372_v19, %s2981_s16 }
 0x636   : > { %1385 = vrot.lane.b32.xlu0 %v1367_v40, %s2981_s16 }
 0x69f   : > { %v1380_v39 = vpop.permute.xlu1 %1379 }
 0x6a0   : > { %v1378_v44 = vpop.permute.xlu0 %1377 }
 0x6a1   : > { %2586 = vmatprep.mubr.msk.f32.mxu1 %vm415_vm1, %v1378_v44 }
 0x6a2   : > { %2587 = vmatmul.mubr.msk.f32.vlgmr.msra.gmra.mrb[14].mxu1 %vm415_vm1, %v1380_v39 }
 0x6a3   : > { %2731 = vmatpush3.bf16.xpose.msk.msra.mxu1 %vm3119_vm2, %v3134_v34  ;;  %v1384_v35 = vpop.permute.xlu1 %1383 }
 0x6a4   : > { %2739 = vmatprep.subr.bf16.mxu1 %v3161_v45  ;;  %v1382_v46 = vpop.permute.xlu0 %1381 }
 0x6a5   : > { %2593 = vmatprep.mubr.msk.f32.mxu1 %vm415_vm1, %v1382_v46 }
 0x6a7   : > { %v1388_v48 = vpop.permute.xlu1 %1387 }
 0x6a8   : > { %v1386_v47 = vpop.permute.xlu0 %1385 }
 0x6a9   : > { %2600 = vmatprep.mubr.msk.f32.mxu0 %vm415_vm1, %v1386_v47 }
 0x6aa   : > { %2594 = vmatmul.mubr.msk.f32.vlgmr.msra.gmra.mrb[16].mxu1 %vm415_vm1, %v1384_v35  ;;  %2601 = vmatmul.mubr.msk.f32.vlgmr.msra.gmra.mrb[8].mxu0 %vm415_vm1, %v1388_v48 }
 0x6ab   : > { %2741 = vmatpush3.bf16.msra.mxu1 %v3161_v45  ;;  %2749 = vmatpush3.bf16.msra.mxu0 %v3259_v8 }
 0x6ac   : > { %2743 = vmatprep.subr.bf16.mxu1 %v3256_v6 }
 0x702   : > { %v2581_v26 = vpop.f32.mrb[12].mxu1 }
 0x703   : > { %v1706_v34 = vsel %vm3211_vm3, %v2581_v26, -inf  ;;  %v1459_v49 = vpop.f32.mrb[13].mxu1 }
 0x704   : > { %v1705_v50 = vsel %vm3216_vm4, %v1459_v49, -inf  ;;  %v1716_v51 = vsel %vm772_vm5, %v1706_v34, -inf }
 0x705   : > { %1717 = vmax.xlane.f32.xlu1 %v1716_v51  ;;  %v1713_v52 = vsel %vm772_vm5, %v1705_v50, -inf }
 0x706   : > { %1714 = vmax.xlane.f32.xlu0 %v1713_v52 }
 0x775   : > { %v2588_v53 = vpop.f32.mrb[14].mxu1 }
 0x776   : > { %v1708_v45 = vsel %vm3211_vm3, %v2588_v53, -inf  ;;  %v1538_v8 = vpop.f32.mrb[15].mxu1  ;;  %v295_v53 = vld [vmem:[%s3475_s5] sm:$0xff] }
 0x777   : > { %v1722_v54 = vsel %vm772_vm5, %v1708_v45, -inf  ;;  %v1707_v55 = vsel %vm3216_vm4, %v1538_v8, -inf }
 0x778   : > { %1723 = vmax.xlane.f32.xlu0 %v1722_v54  ;;  %v1719_v56 = vsel %vm772_vm5, %v1707_v55, -inf }
 0x77c   : > { %1720 = vmax.xlane.f32.xlu0 %v1719_v56  ;;  %v298_v56 = vld [vmem:[%s3475_s5 + $0x18] sm:$0xff] }
 0x77d   : > { %v2595_v57 = vpop.f32.mrb[16].mxu1  ;;  %v2602_v58 = vpop.f32.mrb[8].mxu0 }
 0x77e   : > { %v1710_v22 = vsel %vm3211_vm3, %v2595_v57, -inf  ;;  %v1617_v59 = vpop.f32.mrb[17].mxu1  ;;  %v1696_v60 = vpop.f32.mrb[9].mxu0  ;;  %v1712_v1 = vsel %vm3211_vm3, %v2602_v58, -inf }
 0x77f   : > { %v1709_v61 = vsel %vm3216_vm4, %v1617_v59, -inf  ;;  %v1728_v62 = vsel %vm772_vm5, %v1710_v22, -inf  ;;  %v1711_v5 = vsel %vm3216_vm4, %v1696_v60, -inf  ;;  %v1734_v7 = vsel %vm772_vm5, %v1712_v1, -inf }
 0x780   : > { %1729 = vmax.xlane.f32.xlu0 %v1728_v62  ;;  %v1725_v4 = vsel %vm772_vm5, %v1709_v61, -inf  ;;  %v1731_v9 = vsel %vm772_vm5, %v1711_v5, -inf }
 0x781   : > { %1726 = vmax.xlane.f32.xlu1 %v1725_v4 }
 0x784   : > { %1735 = vmax.xlane.f32.xlu0 %v1734_v7 }
 0x785   : > { %1732 = vmax.xlane.f32.xlu1 %v1731_v9 }
 0x792   : > { %v1718_v10 = vpop.xlane.xlu1 %1717 }
 0x793   : > { %v1738_v11 = vsub.f32 %v1706_v34, %v1718_v10  ;;  %v1715_v12 = vpop.xlane.xlu0 %1714 }
 0x794   : > { %v1737_v13 = vsub.f32 %v1705_v50, %v1715_v12 }
 0x795   : > { %v1747_v14 = vmul.f32 1.442695, %v1738_v11 }
 0x796   : > { %v1745_v2 = vmul.f32 1.442695, %v1737_v13 }
 0x798   : > { %2883 = vpow2.f32 %v1745_v2 }
 0x799   : > { %2885 = vpow2.f32 %v1747_v14 }
 0x7a2   : > { %v2884_v15 = vpop.eup %2883 }
 0x7a3   : > { %v2886_v16 = vpop.eup %2885  ;;  %2607 = vmatprep.mubr.msk.f32.mxu1 %vm772_vm5, %v2884_v15  ;;  %v1761_v48 = vsel %vm772_vm5, %v2884_v15, 0.0 }
 0x7a4   : > { %2608 = vmatmul.mubr.msk.f32.vlgmr.msra.gmra.mrb[18].mxu1 %vm772_vm5, %v2886_v16  ;;  %v1764_v47 = vsel %vm772_vm5, %v2886_v16, 0.0 }
 0x7a5   : > { %2745 = vmatpush3.bf16.msra.mxu1 %v3256_v6 }
 0x7a6   : > { %2751 = vmatprep.subr.bf16.mxu1 %v3273_v25 }
 0x805   : > { %v1724_v3 = vpop.xlane.xlu0 %1723 }
 0x806   : > { %v1740_v18 = vsub.f32 %v1708_v45, %v1724_v3  ;;  %v296_v45 = vld [vmem:[%s3475_s5 + $0x8] sm:$0xff] }
 0x807   : > { %v2754_v8 = vpack.c.bf16 %v296_v45, %v295_v53 }
 0x808   : > { %v1751_v20 = vmul.f32 1.442695, %v1740_v18 }
 0x809   : > { %v1721_v21 = vpop.xlane.xlu0 %1720  ;;  %2755 = vmatprep.subr.bf16.mxu0 %v2754_v8 }
 0x80a   : > { %2887 = vpow2.f32 %v1751_v20  ;;  %v1739_v23 = vsub.f32 %v1707_v55, %v1721_v21  ;;  %v297_v55 = vld [vmem:[%s3475_s5 + $0x10] sm:$0xff] }
 0x80b   : > { %v2758_v57 = vpack.c.bf16 %v298_v56, %v297_v55 }
 0x80c   : > { %v1749_v24 = vmul.f32 1.442695, %v1739_v23 }
 0x80d   : > { %v1730_v28 = vpop.xlane.xlu0 %1729 }
 0x80e   : > { %2889 = vpow2.f32 %v1749_v24  ;;  %v1742_v29 = vsub.f32 %v1710_v22, %v1730_v28  ;;  %v1727_v30 = vpop.xlane.xlu1 %1726 }
 0x80f   : > { %v1741_v31 = vsub.f32 %v1709_v61, %v1727_v30 }
 0x810   : > { %v1755_v32 = vmul.f32 1.442695, %v1742_v29 }
 0x811   : > { %v1753_v33 = vmul.f32 1.442695, %v1741_v31  ;;  %v1736_v36 = vpop.xlane.xlu0 %1735 }
 0x812   : > { %2891 = vpow2.f32 %v1755_v32  ;;  %v1744_v37 = vsub.f32 %v1712_v1, %v1736_v36  ;;  %v1733_v6 = vpop.xlane.xlu1 %1732 }
 0x813   : > { %2893 = vpow2.f32 %v1753_v33  ;;  %v1743_v0 = vsub.f32 %v1711_v5, %v1733_v6 }
 0x814   : > { %v2888_v38 = vpop.eup %2887  ;;  %v1759_v41 = vmul.f32 1.442695, %v1744_v37 }
 0x815   : > { %v1757_v27 = vmul.f32 1.442695, %v1743_v0  ;;  %v1770_v42 = vsel %vm772_vm5, %v2888_v38, 0.0 }
 0x816   : > { %2895 = vpow2.f32 %v1759_v41  ;;  %1771 = vadd.xlane.f32.xlu0 %v1770_v42 }
 0x817   : > { %2897 = vpow2.f32 %v1757_v27  ;;  %v2381_v27 = vld [vmem:[%s3476_s6] ss:$0 sm:$0xff] }
 0x818   : > { %v2890_v63 = vpop.eup %2889 }
 0x819   : > { %2614 = vmatprep.mubr.msk.f32.mxu1 %vm772_vm5, %v2890_v63  ;;  %v1767_v17 = vsel %vm772_vm5, %v2890_v63, 0.0 }
 0x81a   : > { %2615 = vmatmul.mubr.msk.f32.vlgmr.msra.gmra.mrb[20].mxu1 %vm772_vm5, %v2888_v38  ;;  %1768 = vadd.xlane.f32.xlu1 %v1767_v17 }
 0x81b   : > { %2753 = vmatpush3.bf16.msra.mxu1 %v3273_v25 }
 0x81c   : > { %v2892_v19 = vpop.eup %2891 }
 0x81d   : > { %v2894_v43 = vpop.eup %2893  ;;  %v1776_v40 = vsel %vm772_vm5, %v2892_v19, 0.0 }
 0x81e   : > { %2621 = vmatprep.mubr.msk.f32.mxu0 %vm772_vm5, %v2894_v43  ;;  %1777 = vadd.xlane.f32.xlu0 %v1776_v40  ;;  %v1773_v39 = vsel %vm772_vm5, %v2894_v43, 0.0 }
 0x81f   : > { %2622 = vmatmul.mubr.msk.f32.vlgmr.msra.gmra.mrb[10].mxu0 %vm772_vm5, %v2892_v19  ;;  %1774 = vadd.xlane.f32.xlu1 %v1773_v39 }
 0x820   : > { %v2896_v44 = vpop.eup %2895  ;;  %2757 = vmatpush3.bf16.msra.mxu0 %v2754_v8 }
 0x821   : > { %v2898_v35 = vpop.eup %2897  ;;  %v1782_v46 = vsel %vm772_vm5, %v2896_v44, 0.0  ;;  %2759 = vmatprep.subr.bf16.mxu0 %v2758_v57 }
 0x822   : > { %2628 = vmatprep.mubr.msk.f32.mxu1 %vm772_vm5, %v2898_v35  ;;  %1783 = vadd.xlane.f32.xlu0 %v1782_v46  ;;  %v1779_v25 = vsel %vm772_vm5, %v2898_v35, 0.0 }
 0x823   : > { %2629 = vmatmul.mubr.msk.f32.vlgmr.msra.gmra.mrb[22].mxu1 %vm772_vm5, %v2896_v44  ;;  %1780 = vadd.xlane.f32.xlu1 %v1779_v25 }
 0x824   : > { %2761 = vmatpush3.bf16.msra.mxu0 %v2758_v57 }
 0x826   : > { %1765 = vadd.xlane.f32.xlu0 %v1764_v47 }
 0x827   : > { %1762 = vadd.xlane.f32.xlu1 %v1761_v48 }
 0x877   : > { %v2609_v26 = vpop.f32.mrb[18].mxu1 }
 0x878   : > { %v1857_v34 = vpop.f32.mrb[19].mxu1 }
 0x8a3   : > { %v1772_v50 = vpop.xlane.xlu0 %1771 }
 0x8a4   : > { %2899 = vrcp.f32 %v1772_v50 }
 0x8a7   : > { %v1769_v49 = vpop.xlane.xlu1 %1768 }
 0x8a8   : > { %2901 = vrcp.f32 %v1769_v49 }
 0x8ab   : > { %v1778_v52 = vpop.xlane.xlu0 %1777 }
 0x8ac   : > { %v1775_v51 = vpop.xlane.xlu1 %1774  ;;  %2903 = vrcp.f32 %v1778_v52 }
 0x8ad   : > { %2905 = vrcp.f32 %v1775_v51 }
 0x8ae   : > { %v2900_v58 = vpop.eup %2899 }
 0x8af   : > { %v1784_v22 = vpop.xlane.xlu0 %1783 }
 0x8b0   : > { %v1781_v54 = vpop.xlane.xlu1 %1780 }
 0x8b1   : > { %2907 = vrcp.f32 %v1781_v54 }
 0x8b2   : > { %v2902_v60 = vpop.eup %2901  ;;  %2909 = vrcp.f32 %v1784_v22 }
 0x8b3   : > { %v1766_v18 = vpop.xlane.xlu0 %1765 }
 0x8b4   : > { %v1763_v3 = vpop.xlane.xlu1 %1762 }
 0x8b5   : > { %2911 = vrcp.f32 %v1763_v3 }
 0x8b6   : > { %v2904_v4 = vpop.eup %2903  ;;  %2913 = vrcp.f32 %v1766_v18 }
 0x8b7   : > { %v2906_v10 = vpop.eup %2905 }
 0x8bb   : > { %v2908_v12 = vpop.eup %2907 }
 0x8bc   : > { %v2910_v15 = vpop.eup %2909 }
 0x8bf   : > { %v2912_v21 = vpop.eup %2911 }
 0x8c0   : > { %v2914_v28 = vpop.eup %2913  ;;  %v2117_v29 = vmul.f32 %v2912_v21, %v1857_v34 }
 0x8c1   : > { %v2118_v32 = vmul.f32 %v2914_v28, %v2609_v26 }
 0x8ed   : > { %v2616_v59 = vpop.f32.mrb[20].mxu1 }
 0x8ee   : > { %v2120_v61 = vmul.f32 %v2900_v58, %v2616_v59  ;;  %v1938_v62 = vpop.f32.mrb[21].mxu1 }
 0x8ef   : > { %v2119_v1 = vmul.f32 %v2902_v60, %v1938_v62 }
 0x8f0   : > { %2129 = vrot.lane.b32.xlu0 %v2120_v61, %s2984_s23 }
 0x8f1   : > { %2127 = vrot.lane.b32.xlu1 %v2119_v1, %s2984_s23 }
 0x8f2   : > { %v2623_v5 = vpop.f32.mrb[10].mxu0 }
 0x8f3   : > { %v2122_v7 = vmul.f32 %v2904_v4, %v2623_v5  ;;  %v2019_v9 = vpop.f32.mrb[11].mxu0 }
 0x8f4   : > { %v2121_v13 = vmul.f32 %v2906_v10, %v2019_v9 }
 0x8f5   : > { %2137 = vrot.lane.b32.xlu1 %v2122_v7, %s2985_s29 }
 0x8f6   : > { %v2630_v11 = vpop.f32.mrb[22].mxu1 }
 0x8f7   : > { %v2100_v14 = vpop.f32.mrb[23].mxu1  ;;  %v2124_v16 = vmul.f32 %v2910_v15, %v2630_v11 }
 0x8f8   : > { %v2123_v2 = vmul.f32 %v2908_v12, %v2100_v14 }
 0x8f9   : > { %2135 = vrot.lane.b32.xlu1 %v2121_v13, %s2985_s29  ;;  %s269_s29 = sand.u32 1, %s2969_s25  }
 0x8fa   : > { %2143 = vrot.lane.b32.xlu0 %v2123_v2, %s2986_s8  ;;  %s3428_s20 = scalar_lea.sflag [#allocation3], %s269_s29 }
 0x8fd   : > { %2145 = vrot.lane.b32.xlu1 %v2124_v16, %s2986_s8  ;;  %s2324_s8 = sshll.u32 %s269_s29, 4 }
 0x8fe   : > { %s271_s13 = scalar_lea.vmem [#allocation2], %s2324_s8  ;;  %s2921_s8 = scalar_lea.vmem %s2920_s22, 512 }
 0x8ff   : > { %s2258_s14 = sshll.u32 %s271_s13, 4  ;;  %s3419_s14 = int_to_ptr.vmem [resolvable:$true] %s2258_s14 }
 0x900   : > { %s2915_s28 = scalar_lea.vmem %s3419_s14, 256  ;;  %p2922_p0 = scmp.lt.s32.totalorder %s3419_s14, %s2920_s22 }
 0x901   : > { %p2916_p11 = scmp.ne.s32.totalorder %s3419_s14, %s2915_s28  ;;  %p2923_p1 = scmp.lt.s32.totalorder %s2921_s8, %s2915_s28 }
 0x903   : > { %p2917_p12 = pnand %p2916_p11, %p3068_p5  ;;  %p2924_p2 = por %p2923_p1, %p2922_p0 }
 0x905   : > { %p2918_p13 = pneg %p2917_p12 }
 0x907   : > { %p2925_p3 = pnand %p2924_p2, %p2918_p13 }
 0x962   : > { %v2130_v24 = vpop.permute.xlu0 %2129 }
 0x963   : > { %v2128_v20 = vpop.permute.xlu1 %2127  ;;  %v2150_v6 = vsel %vm415_vm1, %v2118_v32, %v2130_v24 }
 0x964   : > { %v2149_v30 = vsel %vm415_vm1, %v2117_v29, %v2128_v20 }
 0x967   : > { %v2138_v23 = vpop.permute.xlu1 %2137 }
 0x968   : > { %v2152_v0 = vsel %vm772_vm5, %v2150_v6, %v2138_v23 }
 0x96b   : > { %v2136_v31 = vpop.permute.xlu1 %2135 }
 0x96c   : > { %v2144_v33 = vpop.permute.xlu0 %2143  ;;  %v2151_v36 = vsel %vm772_vm5, %v2149_v30, %v2136_v31 }
 0x96d   : > { %v2153_v37 = vsel %vm1237_vm6, %v2151_v36, %v2144_v33 }
 0x96e   : > { %2639 = vmatprep.mubr.msk.f32.mxu0 %vm308_vm0, %v2153_v37 }
 0x96f   : > { %v2146_v38 = vpop.permute.xlu1 %2145 }
 0x970   : > { %v2154_v41 = vsel %vm1237_vm6, %v2152_v0, %v2146_v38 }
 0x971   : > { %2640 = vmatmul.mubr.msk.f32.vlgmr.msra.gmra.mrb[12].mxu0 %vm308_vm0, %v2154_v41 }
 0xa44   : > { %v2641_v42 = vpop.f32.mrb[12].mxu0 }
 0xa45   : > { %v2239_v63 = vadd.f32 %v2641_v42, %v2381_v27  ;;  %v2233_v17 = vpop.f32.mrb[13].mxu0 }
 0xa46   : > { %v2234_v19 = vadd.f32 %v2381_v27, %v2233_v17 }
 0xa47   : > { %2243 = vst.msk [vmem:[%s271_s13 + $0x8] sm:$0xff] %vm308_vm0, %v2239_v63 }
 0xa48   : > { %2242 = vst.msk [vmem:[%s271_s13] sm:$0xff] %vm308_vm0, %v2234_v19 }
 0xa49   : > { %2928 = shalt.err (!%p2925_p3)
}
 0xa4a   : > { %s2929_s29 = scalar_lea.hbm %s3424_s19, 256  ;;  %s2933_s13 = scalar_lea.hbm %s3477_s7, 512 }
 0xa4b   : > { %p2930_p4 = scmp.ne.s32.totalorder %s3424_s19, %s2929_s29  ;;  %p2934_p9 = scmp.lt.u32.totalorder %s3424_s19, %s3477_s7 }
 0xa4c   : > { %p2935_p10 = scmp.lt.u32.totalorder %s2933_s13, %s2929_s29  ;;  %p2937_p12 = scmp.lt.u32.totalorder %s2929_s29, %s3424_s19 }
 0xa4d   : > { %p2931_p7 = pnand %p2930_p4, %p3068_p5 }
 0xa4e   : > { %p2936_p11 = por %p2935_p10, %p2934_p9 }
 0xa4f   : > { %p2932_p8 = pneg %p2931_p7 }
 0xa50   : > { %p2938_p13 = por %p2937_p12, %p2936_p11 }
 0xa52   : > { %p2939_p0 = pnand %p2938_p13, %p2932_p8 }
 0xa54   : > { %2942 = shalt.err (!%p2939_p0)
}
 0xa55   : > { %s2989_s17 = smov 128  }
 0xa56   : > { %2762 = dma.vmem_to_hbm [thread:$0]  (%p3068_p5), %s3419_s14, 256, %s3424_s19, %s3428_s20, %s2989_s17, %s2989_s17, %s2984_s23  }
 0xa57 PF: > { %p2768_p1 = scmp.ge.s32.totalorder %s2977_s27, 2  ;;  %s2273_s28 = sand.u32 1, %s2965_s24  }
 0xa58   : > { %s2274_s21 = scalar_lea.sflag [#allocation3], %s2273_s28 }
 0xa59   : > { %p2765_p2 = pnand %p2768_p1, %p3072_p6 }
 0xa5b   : > { %2960 = dma.done.wait (!%p2765_p2), %s2274_s21, 256  }
 0xa5c   : > { %2962 = vsyncadd (!%p2765_p2), %s2274_s21, 4294967040  ;;  %p17_p3 = scmp.ge.s32.totalorder %s3055_s30, 4   ;;  %s3486_s24 = smov %s2969_s25 }
 0xa5d   : > { %s3487_s25 = smov %s2973_s26  ;;  %s3488_s26 = smov %s3066_s10 }
 0xa5e   : > { %s3489_s27 = smov %s3055_s30  ;;  %19 = sbr.rel (!%p17_p3) target bundleno = 3 (0x3), region = 83 }
 0xa65   :  { %2279 = vsyncpa [#allocation3], 1 }
 0xa66   :  { %2281 = vsyncpa [#allocation3 + $0x1], 1 }

</bundles_post_ra>
